<compile_context>
chip_gen: v7x
topology: tpu7x:2x2x1
jax: 0.10.0
libtpu: 0.0.40
codegen_flags: <defaults>
</compile_context>

<pallas_src>
import functools

import jax
import jax.numpy as jnp
from jax.experimental import pallas as pl
from jax.experimental.pallas import tpu as pltpu

KERNEL_MUL = 2.0
KERNEL_NUM = 5
_LANE = 128


def _mmd_rbf_kernel(src_ref, tgt_ref, out_ref, *, kernel_mul, kernel_num):
    # src_ref: (B, Dp) f32 VMEM, tgt_ref: (B, Dp) f32 VMEM, out_ref: (1, 1) f32 SMEM
    s = src_ref[...]
    t = tgt_ref[...]
    b = s.shape[0]
    n = 2 * b

    # --- pairwise squared L2 distances, block-structured -------------------
    s_sq_e = s * s
    t_sq_e = t * t
    s_row = jnp.sum(s_sq_e, axis=1, keepdims=True)          # (B, 1)
    t_row = jnp.sum(t_sq_e, axis=1, keepdims=True)          # (B, 1)

    # Column-oriented norms (1, B) via a ones-vector contraction (avoids the
    # (B,1)->(1,B) transpose relayout).
    ones_row = jnp.ones((1, s.shape[1]), dtype=jnp.float32)
    dn = (((1,), (1,)), ((), ()))
    s_col = jax.lax.dot_general(ones_row, s_sq_e, dn,
                                preferred_element_type=jnp.float32)  # (1, B)
    t_col = jax.lax.dot_general(ones_row, t_sq_e, dn,
                                preferred_element_type=jnp.float32)  # (1, B)

    def gram(a, c):
        return jax.lax.dot_general(a, c, dn, preferred_element_type=jnp.float32)

    l2_xx = jnp.maximum(s_row + s_col - 2.0 * gram(s, s), 0.0)   # (B, B)
    l2_yy = jnp.maximum(t_row + t_col - 2.0 * gram(t, t), 0.0)   # (B, B)
    l2_xy = jnp.maximum(s_row + t_col - 2.0 * gram(s, t), 0.0)   # (B, B)

    # --- bandwidth (sum over the full N×N matrix via symmetry) --------------
    l2_sum = jnp.sum(l2_xx) + jnp.sum(l2_yy) + 2.0 * jnp.sum(l2_xy)
    bandwidth = l2_sum / jnp.float32(n * n - n)
    bandwidth = bandwidth / jnp.float32(kernel_mul ** (kernel_num // 2))
    bandwidth = jnp.maximum(bandwidth, jnp.float32(1e-12))  # guard degenerate input

    # Largest bandwidth term; one scalar reciprocal instead of N²-sized divides.
    bw_max = bandwidth * jnp.float32(kernel_mul ** (kernel_num - 1))
    neg_inv_bw_max = -1.0 / bw_max

    if kernel_mul == 2.0:
        # exp(-l2/(bw*2^i)) = (exp(-l2/(bw*2^(kernel_num-1))))^(2^(kernel_num-1-i)):
        # one EUP exp per block, the rest are VALU squarings.
        def block_kernel_sum(l2_block):
            cur = jnp.exp(l2_block * neg_inv_bw_max)
            total = jnp.sum(cur)
            for _ in range(kernel_num - 1):
                cur = cur * cur
                total = total + jnp.sum(cur)
            return total
    else:
        # Generic path (kernel_mul != 2): still reciprocal-multiply, no divides.
        def block_kernel_sum(l2_block):
            total = jnp.float32(0.0)
            for i in range(kernel_num):
                neg_inv_bw = -1.0 / (bandwidth * jnp.float32(kernel_mul ** i))
                total = total + jnp.sum(jnp.exp(l2_block * neg_inv_bw))
            return total

    sum_xx = block_kernel_sum(l2_xx)
    sum_yy = block_kernel_sum(l2_yy)
    sum_xy = block_kernel_sum(l2_xy)

    inv_b2 = 1.0 / jnp.float32(b * b)
    # mean(XX) + mean(YY) - mean(XY) - mean(YX), with mean(YX) == mean(XY).
    out_ref[0, 0] = (sum_xx + sum_yy - 2.0 * sum_xy) * inv_b2


def mmd_loss_rbf(source, target, kernel_mul=KERNEL_MUL, kernel_num=KERNEL_NUM):
    B, D = source.shape
    assert target.shape == (B, D)

    src = source.astype(jnp.float32)
    tgt = target.astype(jnp.float32)

    # Zero-pad feature dim to a lane-dense multiple of 128 (exact: padded zeros
    # contribute nothing to norms or the Gram).
    Dp = ((D + _LANE - 1) // _LANE) * _LANE
    if Dp != D:
        pad = ((0, 0), (0, Dp - D))
        src = jnp.pad(src, pad)
        tgt = jnp.pad(tgt, pad)

    kernel = functools.partial(_mmd_rbf_kernel,
                               kernel_mul=kernel_mul, kernel_num=kernel_num)
    out = pl.pallas_call(
        kernel,
        out_shape=jax.ShapeDtypeStruct((1, 1), jnp.float32),
        in_specs=[
            pl.BlockSpec(memory_space=pltpu.MemorySpace.VMEM),
            pl.BlockSpec(memory_space=pltpu.MemorySpace.VMEM),
        ],
        out_specs=pl.BlockSpec(memory_space=pltpu.MemorySpace.SMEM),
    )(src, tgt)
    return out[0, 0]


def _mmd_loss_rbf_ref(source, target, kernel_mul=KERNEL_MUL, kernel_num=KERNEL_NUM):
    # Pure-JAX reference that mirrors the PyTorch code literally.
    source = source.astype(jnp.float32)
    target = target.astype(jnp.float32)
    b = source.shape[0]
    total = jnp.concatenate([source, target], axis=0)
    n = total.shape[0]
    diff = total[None, :, :] - total[:, None, :]
    l2 = jnp.sum(diff * diff, axis=2)
    bandwidth = jnp.sum(l2) / (n * n - n)
    bandwidth = bandwidth / (kernel_mul ** (kernel_num // 2))
    kernels = sum(jnp.exp(-l2 / (bandwidth * kernel_mul ** i))
                  for i in range(kernel_num))
    xx = jnp.mean(kernels[:b, :b])
    yy = jnp.mean(kernels[b:, b:])
    xy = jnp.mean(kernels[:b, b:])
    yx = jnp.mean(kernels[b:, :b])
    return xx + yy - xy - yx


if __name__ == "__main__":
    key = jax.random.PRNGKey(0)
    k_src, k_tgt = jax.random.split(key)
    B, D = 8, 32
    source = jax.random.normal(k_src, (B, D), dtype=jnp.float32)
    target = 0.5 * jax.random.normal(k_tgt, (B, D), dtype=jnp.float32) + 0.3

    loss = jax.block_until_ready(mmd_loss_rbf(source, target))
    ref = jax.block_until_ready(_mmd_loss_rbf_ref(source, target))
    assert jnp.allclose(loss, ref, rtol=1e-3, atol=1e-5), (loss, ref)

    print("KERNEL_OK")
</pallas_src>

<mosaic_0001>
module attributes {stable_mosaic.version = 11 : i64} {
  func.func @_mmd_rbf_kernel(%arg0: memref<8x128xf32, #tpu.memory_space<vmem>>, %arg1: memref<8x128xf32, #tpu.memory_space<vmem>>, %arg2: memref<1x1xf32, #tpu.memory_space<smem>>) attributes {dimension_semantics = [], scalar_prefetch = 0 : i64, scratch_operands = 0 : i64, tpu.core_type = #tpu.core_type<tc>} {
    %c0 = arith.constant 0 : index
    %c0_0 = arith.constant 0 : index
    %0 = vector.load %arg0[%c0, %c0_0] : memref<8x128xf32, #tpu.memory_space<vmem>>, vector<8x128xf32>
    %c0_1 = arith.constant 0 : index
    %c0_2 = arith.constant 0 : index
    %1 = vector.load %arg1[%c0_1, %c0_2] : memref<8x128xf32, #tpu.memory_space<vmem>>, vector<8x128xf32>
    %2 = arith.mulf %0, %0 : vector<8x128xf32>
    %3 = arith.mulf %1, %1 : vector<8x128xf32>
    %cst = arith.constant dense<0.000000e+00> : vector<8xf32>
    %4 = vector.multi_reduction <add>, %2, %cst [1] : vector<8x128xf32> to vector<8xf32>
    %5 = vector.shape_cast %4 : vector<8xf32> to vector<8x1xf32>
    %cst_3 = arith.constant dense<0.000000e+00> : vector<8xf32>
    %6 = vector.multi_reduction <add>, %3, %cst_3 [1] : vector<8x128xf32> to vector<8xf32>
    %7 = vector.shape_cast %6 : vector<8xf32> to vector<8x1xf32>
    %cst_4 = arith.constant 1.000000e+00 : f32
    %8 = vector.broadcast %cst_4 : f32 to vector<1x128xf32>
    %cst_5 = arith.constant dense<0.000000e+00> : vector<1x8xf32>
    %9 = tpu.matmul %8, %2, %cst_5 {dimension_numbers = #tpu.dot_dimension_numbers<[1], [1], [0], [0], [0, 0, 1, 0], [], []>} : vector<1x128xf32>, vector<8x128xf32>, vector<1x8xf32> -> vector<1x8xf32>
    %cst_6 = arith.constant dense<0.000000e+00> : vector<1x8xf32>
    %10 = tpu.matmul %8, %3, %cst_6 {dimension_numbers = #tpu.dot_dimension_numbers<[1], [1], [0], [0], [0, 0, 1, 0], [], []>} : vector<1x128xf32>, vector<8x128xf32>, vector<1x8xf32> -> vector<1x8xf32>
    %11 = vector.broadcast %5 : vector<8x1xf32> to vector<8x8xf32>
    %12 = vector.broadcast %9 : vector<1x8xf32> to vector<8x8xf32>
    %13 = arith.addf %11, %12 : vector<8x8xf32>
    %cst_7 = arith.constant dense<0.000000e+00> : vector<8x8xf32>
    %14 = tpu.matmul %0, %0, %cst_7 {dimension_numbers = #tpu.dot_dimension_numbers<[1], [1], [0], [0], [0, 0, 1, 0], [], []>} : vector<8x128xf32>, vector<8x128xf32>, vector<8x8xf32> -> vector<8x8xf32>
    %cst_8 = arith.constant 2.000000e+00 : f32
    %15 = vector.broadcast %cst_8 : f32 to vector<8x8xf32>
    %16 = arith.mulf %15, %14 : vector<8x8xf32>
    %17 = arith.subf %13, %16 : vector<8x8xf32>
    %cst_9 = arith.constant 0.000000e+00 : f32
    %18 = vector.broadcast %cst_9 : f32 to vector<8x8xf32>
    %19 = arith.maximumf %17, %18 : vector<8x8xf32>
    %20 = vector.broadcast %7 : vector<8x1xf32> to vector<8x8xf32>
    %21 = vector.broadcast %10 : vector<1x8xf32> to vector<8x8xf32>
    %22 = arith.addf %20, %21 : vector<8x8xf32>
    %cst_10 = arith.constant dense<0.000000e+00> : vector<8x8xf32>
    %23 = tpu.matmul %1, %1, %cst_10 {dimension_numbers = #tpu.dot_dimension_numbers<[1], [1], [0], [0], [0, 0, 1, 0], [], []>} : vector<8x128xf32>, vector<8x128xf32>, vector<8x8xf32> -> vector<8x8xf32>
    %cst_11 = arith.constant 2.000000e+00 : f32
    %24 = vector.broadcast %cst_11 : f32 to vector<8x8xf32>
    %25 = arith.mulf %24, %23 : vector<8x8xf32>
    %26 = arith.subf %22, %25 : vector<8x8xf32>
    %cst_12 = arith.constant 0.000000e+00 : f32
    %27 = vector.broadcast %cst_12 : f32 to vector<8x8xf32>
    %28 = arith.maximumf %26, %27 : vector<8x8xf32>
    %29 = vector.broadcast %5 : vector<8x1xf32> to vector<8x8xf32>
    %30 = vector.broadcast %10 : vector<1x8xf32> to vector<8x8xf32>
    %31 = arith.addf %29, %30 : vector<8x8xf32>
    %cst_13 = arith.constant dense<0.000000e+00> : vector<8x8xf32>
    %32 = tpu.matmul %0, %1, %cst_13 {dimension_numbers = #tpu.dot_dimension_numbers<[1], [1], [0], [0], [0, 0, 1, 0], [], []>} : vector<8x128xf32>, vector<8x128xf32>, vector<8x8xf32> -> vector<8x8xf32>
    %cst_14 = arith.constant 2.000000e+00 : f32
    %33 = vector.broadcast %cst_14 : f32 to vector<8x8xf32>
    %34 = arith.mulf %33, %32 : vector<8x8xf32>
    %35 = arith.subf %31, %34 : vector<8x8xf32>
    %cst_15 = arith.constant 0.000000e+00 : f32
    %36 = vector.broadcast %cst_15 : f32 to vector<8x8xf32>
    %37 = arith.maximumf %35, %36 : vector<8x8xf32>
    %38 = vector.shape_cast %19 : vector<8x8xf32> to vector<1x8x8xf32>
    %cst_16 = arith.constant dense<0.000000e+00> : vector<1xf32>
    %39 = vector.multi_reduction <add>, %38, %cst_16 [1, 2] : vector<1x8x8xf32> to vector<1xf32>
    %40 = vector.shape_cast %39 : vector<1xf32> to vector<1x1x1xf32>
    %41 = vector.extract %40[0, 0, 0] : f32 from vector<1x1x1xf32>
    %42 = vector.shape_cast %28 : vector<8x8xf32> to vector<1x8x8xf32>
    %cst_17 = arith.constant dense<0.000000e+00> : vector<1xf32>
    %43 = vector.multi_reduction <add>, %42, %cst_17 [1, 2] : vector<1x8x8xf32> to vector<1xf32>
    %44 = vector.shape_cast %43 : vector<1xf32> to vector<1x1x1xf32>
    %45 = vector.extract %44[0, 0, 0] : f32 from vector<1x1x1xf32>
    %46 = arith.addf %41, %45 : f32
    %47 = vector.shape_cast %37 : vector<8x8xf32> to vector<1x8x8xf32>
    %cst_18 = arith.constant dense<0.000000e+00> : vector<1xf32>
    %48 = vector.multi_reduction <add>, %47, %cst_18 [1, 2] : vector<1x8x8xf32> to vector<1xf32>
    %49 = vector.shape_cast %48 : vector<1xf32> to vector<1x1x1xf32>
    %50 = vector.extract %49[0, 0, 0] : f32 from vector<1x1x1xf32>
    %cst_19 = arith.constant 2.000000e+00 : f32
    %51 = arith.mulf %cst_19, %50 : f32
    %52 = arith.addf %46, %51 : f32
    %cst_20 = arith.constant 2.400000e+02 : f32
    %53 = arith.divf %52, %cst_20 : f32
    %cst_21 = arith.constant 4.000000e+00 : f32
    %54 = arith.divf %53, %cst_21 : f32
    %cst_22 = arith.constant 9.99999996E-13 : f32
    %55 = arith.maximumf %54, %cst_22 : f32
    %cst_23 = arith.constant 1.600000e+01 : f32
    %56 = arith.mulf %55, %cst_23 : f32
    %cst_24 = arith.constant -1.000000e+00 : f32
    %57 = arith.divf %cst_24, %56 : f32
    %58 = vector.broadcast %57 : f32 to vector<8x8xf32>
    %59 = arith.mulf %19, %58 : vector<8x8xf32>
    %60 = math.exp %59 : vector<8x8xf32>
    %61 = vector.shape_cast %60 : vector<8x8xf32> to vector<1x8x8xf32>
    %cst_25 = arith.constant dense<0.000000e+00> : vector<1xf32>
    %62 = vector.multi_reduction <add>, %61, %cst_25 [1, 2] : vector<1x8x8xf32> to vector<1xf32>
    %63 = vector.shape_cast %62 : vector<1xf32> to vector<1x1x1xf32>
    %64 = vector.extract %63[0, 0, 0] : f32 from vector<1x1x1xf32>
    %65 = arith.mulf %60, %60 : vector<8x8xf32>
    %66 = vector.shape_cast %65 : vector<8x8xf32> to vector<1x8x8xf32>
    %cst_26 = arith.constant dense<0.000000e+00> : vector<1xf32>
    %67 = vector.multi_reduction <add>, %66, %cst_26 [1, 2] : vector<1x8x8xf32> to vector<1xf32>
    %68 = vector.shape_cast %67 : vector<1xf32> to vector<1x1x1xf32>
    %69 = vector.extract %68[0, 0, 0] : f32 from vector<1x1x1xf32>
    %70 = arith.addf %64, %69 : f32
    %71 = arith.mulf %65, %65 : vector<8x8xf32>
    %72 = vector.shape_cast %71 : vector<8x8xf32> to vector<1x8x8xf32>
    %cst_27 = arith.constant dense<0.000000e+00> : vector<1xf32>
    %73 = vector.multi_reduction <add>, %72, %cst_27 [1, 2] : vector<1x8x8xf32> to vector<1xf32>
    %74 = vector.shape_cast %73 : vector<1xf32> to vector<1x1x1xf32>
    %75 = vector.extract %74[0, 0, 0] : f32 from vector<1x1x1xf32>
    %76 = arith.addf %70, %75 : f32
    %77 = arith.mulf %71, %71 : vector<8x8xf32>
    %78 = vector.shape_cast %77 : vector<8x8xf32> to vector<1x8x8xf32>
    %cst_28 = arith.constant dense<0.000000e+00> : vector<1xf32>
    %79 = vector.multi_reduction <add>, %78, %cst_28 [1, 2] : vector<1x8x8xf32> to vector<1xf32>
    %80 = vector.shape_cast %79 : vector<1xf32> to vector<1x1x1xf32>
    %81 = vector.extract %80[0, 0, 0] : f32 from vector<1x1x1xf32>
    %82 = arith.addf %76, %81 : f32
    %83 = arith.mulf %77, %77 : vector<8x8xf32>
    %84 = vector.shape_cast %83 : vector<8x8xf32> to vector<1x8x8xf32>
    %cst_29 = arith.constant dense<0.000000e+00> : vector<1xf32>
    %85 = vector.multi_reduction <add>, %84, %cst_29 [1, 2] : vector<1x8x8xf32> to vector<1xf32>
    %86 = vector.shape_cast %85 : vector<1xf32> to vector<1x1x1xf32>
    %87 = vector.extract %86[0, 0, 0] : f32 from vector<1x1x1xf32>
    %88 = arith.addf %82, %87 : f32
    %89 = vector.broadcast %57 : f32 to vector<8x8xf32>
    %90 = arith.mulf %28, %89 : vector<8x8xf32>
    %91 = math.exp %90 : vector<8x8xf32>
    %92 = vector.shape_cast %91 : vector<8x8xf32> to vector<1x8x8xf32>
    %cst_30 = arith.constant dense<0.000000e+00> : vector<1xf32>
    %93 = vector.multi_reduction <add>, %92, %cst_30 [1, 2] : vector<1x8x8xf32> to vector<1xf32>
    %94 = vector.shape_cast %93 : vector<1xf32> to vector<1x1x1xf32>
    %95 = vector.extract %94[0, 0, 0] : f32 from vector<1x1x1xf32>
    %96 = arith.mulf %91, %91 : vector<8x8xf32>
    %97 = vector.shape_cast %96 : vector<8x8xf32> to vector<1x8x8xf32>
    %cst_31 = arith.constant dense<0.000000e+00> : vector<1xf32>
    %98 = vector.multi_reduction <add>, %97, %cst_31 [1, 2] : vector<1x8x8xf32> to vector<1xf32>
    %99 = vector.shape_cast %98 : vector<1xf32> to vector<1x1x1xf32>
    %100 = vector.extract %99[0, 0, 0] : f32 from vector<1x1x1xf32>
    %101 = arith.addf %95, %100 : f32
    %102 = arith.mulf %96, %96 : vector<8x8xf32>
    %103 = vector.shape_cast %102 : vector<8x8xf32> to vector<1x8x8xf32>
    %cst_32 = arith.constant dense<0.000000e+00> : vector<1xf32>
    %104 = vector.multi_reduction <add>, %103, %cst_32 [1, 2] : vector<1x8x8xf32> to vector<1xf32>
    %105 = vector.shape_cast %104 : vector<1xf32> to vector<1x1x1xf32>
    %106 = vector.extract %105[0, 0, 0] : f32 from vector<1x1x1xf32>
    %107 = arith.addf %101, %106 : f32
    %108 = arith.mulf %102, %102 : vector<8x8xf32>
    %109 = vector.shape_cast %108 : vector<8x8xf32> to vector<1x8x8xf32>
    %cst_33 = arith.constant dense<0.000000e+00> : vector<1xf32>
    %110 = vector.multi_reduction <add>, %109, %cst_33 [1, 2] : vector<1x8x8xf32> to vector<1xf32>
    %111 = vector.shape_cast %110 : vector<1xf32> to vector<1x1x1xf32>
    %112 = vector.extract %111[0, 0, 0] : f32 from vector<1x1x1xf32>
    %113 = arith.addf %107, %112 : f32
    %114 = arith.mulf %108, %108 : vector<8x8xf32>
    %115 = vector.shape_cast %114 : vector<8x8xf32> to vector<1x8x8xf32>
    %cst_34 = arith.constant dense<0.000000e+00> : vector<1xf32>
    %116 = vector.multi_reduction <add>, %115, %cst_34 [1, 2] : vector<1x8x8xf32> to vector<1xf32>
    %117 = vector.shape_cast %116 : vector<1xf32> to vector<1x1x1xf32>
    %118 = vector.extract %117[0, 0, 0] : f32 from vector<1x1x1xf32>
    %119 = arith.addf %113, %118 : f32
    %120 = vector.broadcast %57 : f32 to vector<8x8xf32>
    %121 = arith.mulf %37, %120 : vector<8x8xf32>
    %122 = math.exp %121 : vector<8x8xf32>
    %123 = vector.shape_cast %122 : vector<8x8xf32> to vector<1x8x8xf32>
    %cst_35 = arith.constant dense<0.000000e+00> : vector<1xf32>
    %124 = vector.multi_reduction <add>, %123, %cst_35 [1, 2] : vector<1x8x8xf32> to vector<1xf32>
    %125 = vector.shape_cast %124 : vector<1xf32> to vector<1x1x1xf32>
    %126 = vector.extract %125[0, 0, 0] : f32 from vector<1x1x1xf32>
    %127 = arith.mulf %122, %122 : vector<8x8xf32>
    %128 = vector.shape_cast %127 : vector<8x8xf32> to vector<1x8x8xf32>
    %cst_36 = arith.constant dense<0.000000e+00> : vector<1xf32>
    %129 = vector.multi_reduction <add>, %128, %cst_36 [1, 2] : vector<1x8x8xf32> to vector<1xf32>
    %130 = vector.shape_cast %129 : vector<1xf32> to vector<1x1x1xf32>
    %131 = vector.extract %130[0, 0, 0] : f32 from vector<1x1x1xf32>
    %132 = arith.addf %126, %131 : f32
    %133 = arith.mulf %127, %127 : vector<8x8xf32>
    %134 = vector.shape_cast %133 : vector<8x8xf32> to vector<1x8x8xf32>
    %cst_37 = arith.constant dense<0.000000e+00> : vector<1xf32>
    %135 = vector.multi_reduction <add>, %134, %cst_37 [1, 2] : vector<1x8x8xf32> to vector<1xf32>
    %136 = vector.shape_cast %135 : vector<1xf32> to vector<1x1x1xf32>
    %137 = vector.extract %136[0, 0, 0] : f32 from vector<1x1x1xf32>
    %138 = arith.addf %132, %137 : f32
    %139 = arith.mulf %133, %133 : vector<8x8xf32>
    %140 = vector.shape_cast %139 : vector<8x8xf32> to vector<1x8x8xf32>
    %cst_38 = arith.constant dense<0.000000e+00> : vector<1xf32>
    %141 = vector.multi_reduction <add>, %140, %cst_38 [1, 2] : vector<1x8x8xf32> to vector<1xf32>
    %142 = vector.shape_cast %141 : vector<1xf32> to vector<1x1x1xf32>
    %143 = vector.extract %142[0, 0, 0] : f32 from vector<1x1x1xf32>
    %144 = arith.addf %138, %143 : f32
    %145 = arith.mulf %139, %139 : vector<8x8xf32>
    %146 = vector.shape_cast %145 : vector<8x8xf32> to vector<1x8x8xf32>
    %cst_39 = arith.constant dense<0.000000e+00> : vector<1xf32>
    %147 = vector.multi_reduction <add>, %146, %cst_39 [1, 2] : vector<1x8x8xf32> to vector<1xf32>
    %148 = vector.shape_cast %147 : vector<1xf32> to vector<1x1x1xf32>
    %149 = vector.extract %148[0, 0, 0] : f32 from vector<1x1x1xf32>
    %150 = arith.addf %144, %149 : f32
    %cst_40 = arith.constant 1.000000e+00 : f32
    %cst_41 = arith.constant 6.400000e+01 : f32
    %151 = arith.divf %cst_40, %cst_41 : f32
    %152 = arith.addf %88, %119 : f32
    %cst_42 = arith.constant 2.000000e+00 : f32
    %153 = arith.mulf %cst_42, %150 : f32
    %154 = arith.subf %152, %153 : f32
    %155 = arith.mulf %154, %151 : f32
    %c0_43 = arith.constant 0 : index
    %c0_44 = arith.constant 0 : index
    %156 = memref.load %arg2[%c0_43, %c0_44] : memref<1x1xf32, #tpu.memory_space<smem>>
    memref.store %155, %arg2[%c0_43, %c0_44] : memref<1x1xf32, #tpu.memory_space<smem>>
    return
  }
}

</mosaic_0001>

<bundles_post_ra>
// kernel: tpu_custom_call.1
= control target key start
LH: loop header
LB: loop body
LE: loop exit
PB: predicated region body
PF: predicated region fallthrough
CT: control target
= control target key end

     0   :  { %7 = vsyncpa [#allocation3], 0  ;;  %s894_s0 = inlined_call_operand.hbm [shape: f32[8,128], index: 0, kind: input, shape index: {}]   ;;  %s895_s1 = inlined_call_operand.hbm [shape: f32[8,128], index: 1, kind: input, shape index: {}]   ;;  %s896_s2 = inlined_call_operand.hbm [shape: f32[1,1], index: 2, kind: output, shape index: {}]  }
   0x1   :  { %8 = vsyncpa [#allocation6], 0 }
   0x2   :  { %9 = vsyncpa [#allocation4], 0  ;;  %s813_s9 = smov [#allocation2]   ;;  %s814_s11 = smov [#allocation5]  }
   0x3   :  { %s16_s10 = sshll.u32 %s813_s9, 4  ;;  %s26_s12 = sshll.u32 %s814_s11, 4  ;;  %s17_s10 = int_to_ptr.vmem [resolvable:$true] %s16_s10  ;;  %s27_s12 = int_to_ptr.vmem [resolvable:$true] %s26_s12 }
   0x4   :  { %s753_s15 = scalar_lea.hbm %s894_s0, 128 }
   0x5   :  { %p754_p0 = scmp.ne.s32.totalorder %s894_s0, %s753_s15  ;;  %p757_p1 = scmp.lt.u32.totalorder %s753_s15, %s894_s0 }
   0x7   :  { %p759_p2 = pnand %p757_p1, %p754_p0 }
   0x9   :  { %762 = shalt.err (!%p759_p2)
}
   0xa   :  { %s763_s20 = scalar_lea.vmem %s17_s10, 128  ;;  %p768_p4 = scmp.lt.s32.totalorder %s17_s10, %s17_s10 }
   0xb   :  { %p764_p3 = scmp.ne.s32.totalorder %s17_s10, %s763_s20  ;;  %p769_p5 = scmp.lt.s32.totalorder %s763_s20, %s763_s20 }
   0xd   :  { %p770_p6 = por %p769_p5, %p768_p4 }
   0xf   :  { %p771_p7 = pnand %p770_p6, %p764_p3 }
  0x11   :  { %774 = shalt.err (!%p771_p7)
}
  0x12   :  { %19 = dma.hbm_to_vmem [thread:$0]  %s894_s0, 128, %s17_s10, [#allocation3]  }
  0x13   :  { %s775_s25 = scalar_lea.hbm %s895_s1, 128 }
  0x14   :  { %p776_p8 = scmp.ne.s32.totalorder %s895_s1, %s775_s25  ;;  %p779_p9 = scmp.lt.u32.totalorder %s775_s25, %s895_s1 }
  0x16   :  { %p781_p10 = pnand %p779_p9, %p776_p8 }
  0x18   :  { %784 = shalt.err (!%p781_p10)
}
  0x19   :  { %s785_s30 = scalar_lea.vmem %s27_s12, 128  ;;  %p790_p12 = scmp.lt.s32.totalorder %s27_s12, %s27_s12 }
  0x1a   :  { %p786_p11 = scmp.ne.s32.totalorder %s27_s12, %s785_s30  ;;  %p791_p13 = scmp.lt.s32.totalorder %s785_s30, %s785_s30 }
  0x1c   :  { %p792_p0 = por %p791_p13, %p790_p12 }
  0x1e   :  { %p793_p1 = pnand %p792_p0, %p786_p11 }
  0x20   :  { %796 = shalt.err (!%p793_p1)
}
  0x21   :  { %29 = dma.hbm_to_vmem [thread:$0]  %s895_s1, 128, %s27_s12, [#allocation6]  }
  0x22   :  { %807 = dma.done.wait [#allocation3], 128  }
  0x23   :  { %808 = vsyncadd [#allocation3], 4294967168 }
  0x24   :  { %809 = dma.done.wait [#allocation6], 128  }
  0x25   :  { %810 = vsyncadd [#allocation6], 4294967168  ;;  %v815_v0 = vmov 0.0   ;;  %vm816_vm0 = vmmov 0   ;;  %v36_v1 = vld [vmem:[#allocation2] sm:$0xff]  ;;  %v37_v2 = vld [vmem:[#allocation5] sm:$0xff]  ;;  %v184_v6 = vlaneseq }
  0x26   :  { %675 = vmatprep.subr.mxu0 %v815_v0  ;;  %677 = vmatprep.mubr.msk.f32.mxu0 %vm816_vm0, %v815_v0  ;;  %v38_v3 = vmul.f32 %v36_v1, %v36_v1  ;;  %v39_v4 = vmul.f32 %v37_v2, %v37_v2  ;;  %v817_v5 = vmov 1.0   ;;  %vm414_vm1 = vcmask 64512   ;;  %s818_s11 = smov 1e-12  }
  0x27   :  { %680 = vmatprep.subr.mxu1 %v815_v0  ;;  %682 = vmatprep.mubr.msk.f32.mxu1 %vm816_vm0, %v815_v0  ;;  %v185_v7 = vshrl.u32 %v184_v6, 7 }
  0x28   :  { %676 = vmatpush3.xpose.msra.mxu0 %v38_v3  ;;  %681 = vmatpush3.xpose.msra.mxu1 %v39_v4 }
  0x29   :  { %685 = vmatprep.subr.mxu0 %v815_v0  ;;  %690 = vmatprep.subr.mxu1 %v815_v0  ;;  %v186_v9 = vsub.s32 0, %v185_v7 }
  0x2a   :  { %40 = vadd.xlane.f32.xlu0 %v38_v3 }
  0x2b   :  { %678 = vmatmul.mubr.f32.vlgmr.msra.gmra.mrb[0].mxu0 %v817_v5  ;;  %683 = vmatmul.mubr.f32.vlgmr.msra.gmra.mrb[0].mxu1 %v817_v5 }
  0x2c   :  { %686 = vmatpush3.xpose.msra.mxu0 %v36_v1  ;;  %687 = vmatprep.mubr.msk.f32.mxu0 %vm816_vm0, %v815_v0 }
  0x2d   :  { %691 = vmatpush3.xpose.msra.mxu1 %v37_v2  ;;  %695 = vmatprep.subr.mxu0 %v815_v0 }
  0x2e   :  { %692 = vmatprep.mubr.msk.f32.mxu1 %vm816_vm0, %v815_v0  ;;  %42 = vadd.xlane.f32.xlu0 %v39_v4 }
  0x2f   :  { %688 = vmatmul.mubr.f32.vlgmr.msra.gmra.mrb[2].mxu0 %v36_v1 }
  0x30   :  { %696 = vmatpush3.xpose.msra.mxu0 %v37_v2  ;;  %693 = vmatmul.mubr.f32.vlgmr.msra.gmra.mrb[2].mxu1 %v37_v2 }
  0x31   :  { %697 = vmatprep.mubr.msk.f32.mxu0 %vm816_vm0, %v815_v0 }
  0x33   :  { %698 = vmatmul.mubr.f32.vlgmr.msra.gmra.mrb[4].mxu0 %v36_v1 }
  0xb7   :  { %v41_v8 = vpop.xlane.xlu0 %40 }
  0xbb   :  { %v43_v10 = vpop.xlane.xlu0 %42 }
  0xfe   :  { %v110_v11 = vpop.f32.mrb[0].mxu0  ;;  %v180_v12 = vpop.f32.mrb[0].mxu1 }
  0xff   :  { %v187_v13 = vrot.slane %v110_v11, %v186_v9  ;;  %v679_v14 = vpop.f32.mrb[1].mxu0  ;;  %v684_v15 = vpop.f32.mrb[1].mxu1  ;;  %v265_v16 = vrot.slane %v180_v12, %v186_v9 }
 0x101   :  { %v266_v18 = vadd.f32 %v265_v16, %v43_v10  ;;  %v188_v19 = vadd.f32 %v187_v13, %v41_v8  ;;  %v340_v28 = vadd.f32 %v265_v16, %v41_v8 }
 0x102   :  { %v255_v17 = vpop.f32.mrb[2].mxu0 }
 0x103   :  { %v259_v20 = vmul.f32 2.0, %v255_v17  ;;  %v689_v21 = vpop.f32.mrb[3].mxu0  ;;  %v333_v22 = vpop.f32.mrb[2].mxu1 }
 0x104   :  { %v337_v23 = vmul.f32 2.0, %v333_v22  ;;  %v694_v24 = vpop.f32.mrb[3].mxu1 }
 0x105   :  { %v260_v25 = vsub.f32 %v188_v19, %v259_v20 }
 0x106   :  { %v338_v26 = vsub.f32 %v266_v18, %v337_v23  ;;  %v407_v27 = vpop.f32.mrb[4].mxu0 }
 0x107   :  { %v411_v29 = vmul.f32 2.0, %v407_v27  ;;  %v699_v30 = vpop.f32.mrb[5].mxu0  ;;  %v261_v31 = vmax.f32 %v260_v25, 0.0 }
 0x108   :  { %v339_v34 = vmax.f32 %v338_v26, 0.0 }
 0x109   :  { %v412_v32 = vsub.f32 %v340_v28, %v411_v29  ;;  %v415_v33 = vsel %vm414_vm1, %v261_v31, 0.0 }
 0x10a   :  { %416 = vadd.xlane.f32.xlu1 %v415_v33  ;;  %v425_v36 = vsel %vm414_vm1, %v339_v34, 0.0 }
 0x10b   :  { %v413_v35 = vmax.f32 %v412_v32, 0.0 }
 0x10d   :  { %v436_v37 = vsel %vm414_vm1, %v413_v35, 0.0 }
 0x10e   :  { %426 = vadd.xlane.f32.xlu1 %v425_v36  ;;  %437 = vadd.xlane.f32.xlu0 %v436_v37 }
 0x197   :  { %v417_v38 = vpop.xlane.xlu1 %416 }
 0x198   :  { %v418_v39 = vrot.slane %v417_v38, 4 }
 0x19a   :  { %v419_v40 = vadd.f32 %v418_v39, %v417_v38 }
 0x19b   :  { %v427_v41 = vpop.xlane.xlu1 %426  ;;  %v438_v42 = vpop.xlane.xlu0 %437 }
 0x19c   :  { %v420_v43 = vrot.slane %v419_v40, 2  ;;  %v428_v44 = vrot.slane %v427_v41, 4  ;;  %v439_v45 = vrot.slane %v438_v42, 4 }
 0x19e   :  { %v429_v46 = vadd.f32 %v428_v44, %v427_v41  ;;  %v440_v47 = vadd.f32 %v439_v45, %v438_v42  ;;  %v421_v48 = vadd.f32 %v420_v43, %v419_v40 }
 0x1a0   :  { %v430_v49 = vrot.slane %v429_v46, 2  ;;  %v441_v50 = vrot.slane %v440_v47, 2  ;;  %v422_v51 = vrot.slane %v421_v48, 1 }
 0x1a2   :  { %v423_v52 = vadd.f32 %v422_v51, %v421_v48  ;;  %v431_v53 = vadd.f32 %v430_v49, %v429_v46  ;;  %v442_v54 = vadd.f32 %v441_v50, %v440_v47 }
 0x1a4   :  { %700 = vpush %v423_v52  ;;  %v432_v55 = vrot.slane %v431_v53, 1  ;;  %v443_v56 = vrot.slane %v442_v54, 1 }
 0x1a6   :  { %v433_v57 = vadd.f32 %v432_v55, %v431_v53  ;;  %v444_v58 = vadd.f32 %v443_v56, %v442_v54 }
 0x1a8   :  { %702 = vpush %v433_v57 }
 0x1a9   :  { %704 = vpush %v444_v58 }
 0x1d5   :  { %s701_s1 = spop %700 }
 0x1d9   :  { %s703_s4 = spop %702 }
 0x1da   :  { %s435_s5 = sadd.f32 %s703_s4, %s701_s1  ;;  %s705_s6 = spop %704 }
 0x1db   :  { %s446_s7 = smul.f32 2.0, %s705_s6 }
 0x1dd   :  { %s447_s8 = sadd.f32 %s446_s7, %s435_s5 }
 0x1df   :  { %s450_s9 = smul.f32 0.004166667, %s447_s8 }
 0x1e1   :  { %s453_s10 = smul.f32 0.25, %s450_s9 }
 0x1e3   :  { %s454_s12 = smax.f32 %s818_s11, %s453_s10 }
 0x1e4   :  { %s455_s13 = smul.f32 16.0, %s454_s12 }
 0x1e6   :  { %v456_v59 = vstv %s455_s13 }
 0x1e7   :  { %745 = vrcp.f32 %v456_v59 }
 0x1f1   :  { %v746_v60 = vpop.eup %745 }
 0x1f2   :  { %706 = vpush %v746_v60 }
 0x223   :  { %s707_s14 = spop %706 }
 0x224   :  { %s459_s15 = smul.f32 -1.0, %s707_s14 }
 0x226   :  { %v460_v61 = vstv %s459_s15 }
 0x227   :  { %v461_v62 = vmul.f32 %v460_v61, %v261_v31  ;;  %v522_v63 = vmul.f32 %v460_v61, %v339_v34  ;;  %v583_v0 = vmul.f32 %v460_v61, %v413_v35 }
 0x229   :  { %v462_v1 = vmul.f32 1.442695, %v461_v62  ;;  %v523_v2 = vmul.f32 1.442695, %v522_v63  ;;  %v584_v3 = vmul.f32 1.442695, %v583_v0 }
 0x22b   :  { %747 = vpow2.f32 %v462_v1 }
 0x22c   :  { %749 = vpow2.f32 %v523_v2 }
 0x22d   :  { %751 = vpow2.f32 %v584_v3 }
 0x235   :  { %v748_v4 = vpop.eup %747 }
 0x236   :  { %v750_v5 = vpop.eup %749  ;;  %v464_v6 = vsel %vm414_vm1, %v748_v4, 0.0  ;;  %v474_v9 = vmul.f32 %v748_v4, %v748_v4 }
 0x237   :  { %v752_v7 = vpop.eup %751  ;;  %v525_v8 = vsel %vm414_vm1, %v750_v5, 0.0  ;;  %465 = vadd.xlane.f32.xlu1 %v464_v6  ;;  %v535_v11 = vmul.f32 %v750_v5, %v750_v5 }
 0x238   :  { %526 = vadd.xlane.f32.xlu0 %v525_v8  ;;  %v586_v10 = vsel %vm414_vm1, %v752_v7, 0.0  ;;  %v475_v12 = vsel %vm414_vm1, %v474_v9, 0.0  ;;  %v596_v13 = vmul.f32 %v752_v7, %v752_v7  ;;  %v486_v16 = vmul.f32 %v474_v9, %v474_v9 }
 0x239   :  { %v536_v14 = vsel %vm414_vm1, %v535_v11, 0.0  ;;  %v547_v15 = vmul.f32 %v535_v11, %v535_v11 }
 0x23a   :  { %v597_v17 = vsel %vm414_vm1, %v596_v13, 0.0  ;;  %v487_v18 = vsel %vm414_vm1, %v486_v16, 0.0  ;;  %v498_v19 = vmul.f32 %v486_v16, %v486_v16  ;;  %v608_v24 = vmul.f32 %v596_v13, %v596_v13 }
 0x23b   :  { %587 = vadd.xlane.f32.xlu1 %v586_v10  ;;  %v559_v20 = vmul.f32 %v547_v15, %v547_v15  ;;  %v548_v21 = vsel %vm414_vm1, %v547_v15, 0.0 }
 0x23c   :  { %476 = vadd.xlane.f32.xlu0 %v475_v12  ;;  %v510_v23 = vmul.f32 %v498_v19, %v498_v19  ;;  %v499_v25 = vsel %vm414_vm1, %v498_v19, 0.0  ;;  %v620_v28 = vmul.f32 %v608_v24, %v608_v24  ;;  %v609_v30 = vsel %vm414_vm1, %v608_v24, 0.0 }
 0x23d   :  { %v560_v22 = vsel %vm414_vm1, %v559_v20, 0.0  ;;  %v571_v26 = vmul.f32 %v559_v20, %v559_v20 }
 0x23e   :  { %v511_v27 = vsel %vm414_vm1, %v510_v23, 0.0  ;;  %v632_v31 = vmul.f32 %v620_v28, %v620_v28  ;;  %v621_v32 = vsel %vm414_vm1, %v620_v28, 0.0 }
 0x23f   :  { %537 = vadd.xlane.f32.xlu1 %v536_v14  ;;  %v572_v29 = vsel %vm414_vm1, %v571_v26, 0.0 }
 0x240   :  { %598 = vadd.xlane.f32.xlu0 %v597_v17  ;;  %v633_v33 = vsel %vm414_vm1, %v632_v31, 0.0 }
 0x243   :  { %488 = vadd.xlane.f32.xlu1 %v487_v18 }
 0x244   :  { %549 = vadd.xlane.f32.xlu0 %v548_v21 }
 0x247   :  { %561 = vadd.xlane.f32.xlu1 %v560_v22 }
 0x248   :  { %500 = vadd.xlane.f32.xlu0 %v499_v25 }
 0x24b   :  { %512 = vadd.xlane.f32.xlu1 %v511_v27 }
 0x24c   :  { %573 = vadd.xlane.f32.xlu0 %v572_v29 }
 0x24f   :  { %610 = vadd.xlane.f32.xlu1 %v609_v30 }
 0x250   :  { %622 = vadd.xlane.f32.xlu0 %v621_v32 }
 0x253   :  { %634 = vadd.xlane.f32.xlu1 %v633_v33 }
 0x2c4   :  { %v466_v34 = vpop.xlane.xlu1 %465 }
 0x2c5   :  { %v527_v35 = vpop.xlane.xlu0 %526  ;;  %v467_v36 = vrot.slane %v466_v34, 4 }
 0x2c6   :  { %v528_v48 = vrot.slane %v527_v35, 4 }
 0x2c7   :  { %v468_v37 = vadd.f32 %v467_v36, %v466_v34 }
 0x2c8   :  { %v588_v38 = vpop.xlane.xlu1 %587  ;;  %v529_v57 = vadd.f32 %v528_v48, %v527_v35 }
 0x2c9   :  { %v469_v39 = vrot.slane %v468_v37, 2  ;;  %v477_v40 = vpop.xlane.xlu0 %476  ;;  %v589_v59 = vrot.slane %v588_v38, 4 }
 0x2ca   :  { %v478_v41 = vrot.slane %v477_v40, 4  ;;  %v530_v5 = vrot.slane %v529_v57, 2 }
 0x2cb   :  { %v470_v42 = vadd.f32 %v469_v39, %v468_v37  ;;  %v590_v8 = vadd.f32 %v589_v59, %v588_v38 }
 0x2cc   :  { %v479_v43 = vadd.f32 %v478_v41, %v477_v40  ;;  %v538_v44 = vpop.xlane.xlu1 %537  ;;  %v531_v22 = vadd.f32 %v530_v5, %v529_v57 }
 0x2cd   :  { %v599_v45 = vpop.xlane.xlu0 %598  ;;  %v471_v46 = vrot.slane %v470_v42, 1  ;;  %v539_v52 = vrot.slane %v538_v44, 4  ;;  %v591_v23 = vrot.slane %v590_v8, 2 }
 0x2ce   :  { %v480_v47 = vrot.slane %v479_v43, 2  ;;  %v600_v62 = vrot.slane %v599_v45, 4  ;;  %v532_v38 = vrot.slane %v531_v22, 1 }
 0x2cf   :  { %v472_v49 = vadd.f32 %v471_v46, %v470_v42  ;;  %v540_v63 = vadd.f32 %v539_v52, %v538_v44  ;;  %v592_v44 = vadd.f32 %v591_v23, %v590_v8 }
 0x2d0   :  { %v489_v50 = vpop.xlane.xlu1 %488  ;;  %v481_v51 = vadd.f32 %v480_v47, %v479_v43  ;;  %v601_v11 = vadd.f32 %v600_v62, %v599_v45 }
 0x2d1   :  { %v550_v53 = vpop.xlane.xlu0 %549  ;;  %v490_v54 = vrot.slane %v489_v50, 4  ;;  %708 = vpush %v472_v49  ;;  %v541_v12 = vrot.slane %v540_v63, 2 }
 0x2d2   :  { %v551_v55 = vrot.slane %v550_v53, 4  ;;  %v482_v56 = vrot.slane %v481_v51, 1  ;;  %v602_v27 = vrot.slane %v601_v11, 2 }
 0x2d3   :  { %v491_v58 = vadd.f32 %v490_v54, %v489_v50  ;;  %v542_v31 = vadd.f32 %v541_v12, %v540_v63 }
 0x2d4   :  { %v562_v60 = vpop.xlane.xlu1 %561  ;;  %v483_v61 = vadd.f32 %v482_v56, %v481_v51  ;;  %v552_v3 = vadd.f32 %v551_v55, %v550_v53  ;;  %v603_v52 = vadd.f32 %v602_v27, %v601_v11 }
 0x2d5   :  { %v492_v0 = vrot.slane %v491_v58, 2  ;;  %v501_v1 = vpop.xlane.xlu0 %500  ;;  %v563_v2 = vrot.slane %v562_v60, 4  ;;  %v543_v48 = vrot.slane %v542_v31, 1 }
 0x2d6   :  { %v502_v4 = vrot.slane %v501_v1, 4  ;;  %710 = vpush %v483_v61  ;;  %v553_v16 = vrot.slane %v552_v3, 2  ;;  %v593_v61 = vrot.slane %v592_v44, 1 }
 0x2d7   :  { %v564_v6 = vadd.f32 %v563_v2, %v562_v60  ;;  %v493_v7 = vadd.f32 %v492_v0, %v491_v58  ;;  %v533_v58 = vadd.f32 %v532_v38, %v531_v22  ;;  %v544_v60 = vadd.f32 %v543_v48, %v542_v31 }
 0x2d8   :  { %v503_v9 = vadd.f32 %v502_v4, %v501_v1  ;;  %v513_v10 = vpop.xlane.xlu1 %512  ;;  %v554_v35 = vadd.f32 %v553_v16, %v552_v3  ;;  %v604_v1 = vrot.slane %v603_v52, 1  ;;  %v594_v5 = vadd.f32 %v593_v61, %v592_v44 }
 0x2d9   :  { %v574_v13 = vpop.xlane.xlu0 %573  ;;  %v514_v14 = vrot.slane %v513_v10, 4  ;;  %v494_v15 = vrot.slane %v493_v7, 1  ;;  %v565_v19 = vrot.slane %v564_v6, 2 }
 0x2da   :  { %v504_v17 = vrot.slane %v503_v9, 2  ;;  %v575_v18 = vrot.slane %v574_v13, 4  ;;  %v555_v50 = vrot.slane %v554_v35, 1  ;;  %v605_v8 = vadd.f32 %v604_v1, %v603_v52 }
 0x2db   :  { %v515_v20 = vadd.f32 %v514_v14, %v513_v10  ;;  %v495_v21 = vadd.f32 %v494_v15, %v493_v7  ;;  %v566_v39 = vadd.f32 %v565_v19, %v564_v6 }
 0x2dc   :  { %v576_v24 = vadd.f32 %v575_v18, %v574_v13  ;;  %v611_v25 = vpop.xlane.xlu1 %610  ;;  %v505_v26 = vadd.f32 %v504_v17, %v503_v9  ;;  %v556_v63 = vadd.f32 %v555_v50, %v554_v35 }
 0x2dd   :  { %v516_v28 = vrot.slane %v515_v20, 2  ;;  %v623_v29 = vpop.xlane.xlu0 %622  ;;  %v612_v30 = vrot.slane %v611_v25, 4  ;;  %712 = vpush %v495_v21  ;;  %v567_v55 = vrot.slane %v566_v39, 1 }
 0x2de   :  { %v577_v32 = vrot.slane %v576_v24, 2  ;;  %v624_v33 = vrot.slane %v623_v29, 4  ;;  %v506_v34 = vrot.slane %v505_v26, 1 }
 0x2df   :  { %v613_v36 = vadd.f32 %v612_v30, %v611_v25  ;;  %v517_v37 = vadd.f32 %v516_v28, %v515_v20  ;;  %v568_v4 = vadd.f32 %v567_v55, %v566_v39 }
 0x2e0   :  { %v625_v40 = vadd.f32 %v624_v33, %v623_v29  ;;  %v635_v41 = vpop.xlane.xlu1 %634  ;;  %v507_v42 = vadd.f32 %v506_v34, %v505_v26  ;;  %v578_v43 = vadd.f32 %v577_v32, %v576_v24 }
 0x2e1   :  { %v614_v45 = vrot.slane %v613_v36, 2  ;;  %v636_v46 = vrot.slane %v635_v41, 4  ;;  %v518_v47 = vrot.slane %v517_v37, 1 }
 0x2e2   :  { %v626_v49 = vrot.slane %v625_v40, 2  ;;  %714 = vpush %v507_v42  ;;  %v579_v51 = vrot.slane %v578_v43, 1 }
 0x2e3   :  { %v637_v53 = vadd.f32 %v636_v46, %v635_v41  ;;  %v519_v54 = vadd.f32 %v518_v47, %v517_v37  ;;  %v615_v56 = vadd.f32 %v614_v45, %v613_v36 }
 0x2e4   :  { %v627_v57 = vadd.f32 %v626_v49, %v625_v40  ;;  %v580_v0 = vadd.f32 %v579_v51, %v578_v43 }
 0x2e5   :  { %v638_v59 = vrot.slane %v637_v53, 2  ;;  %716 = vpush %v519_v54  ;;  %v616_v62 = vrot.slane %v615_v56, 1 }
 0x2e6   :  { %718 = vpush %v533_v58  ;;  %v628_v2 = vrot.slane %v627_v57, 1 }
 0x2e7   :  { %v639_v3 = vadd.f32 %v638_v59, %v637_v53  ;;  %720 = vpush %v544_v60  ;;  %v617_v6 = vadd.f32 %v616_v62, %v615_v56 }
 0x2e8   :  { %722 = vpush %v556_v63  ;;  %v629_v9 = vadd.f32 %v628_v2, %v627_v57 }
 0x2e9   :  { %724 = vpush %v568_v4  ;;  %v640_v7 = vrot.slane %v639_v3, 1 }
 0x2ea   :  { %726 = vpush %v580_v0 }
 0x2eb   :  { %728 = vpush %v594_v5  ;;  %v641_v10 = vadd.f32 %v640_v7, %v639_v3 }
 0x2ec   :  { %730 = vpush %v605_v8 }
 0x2ed   :  { %732 = vpush %v617_v6 }
 0x2ee   :  { %734 = vpush %v629_v9 }
 0x2ef   :  { %736 = vpush %v641_v10 }
 0x302   :  { %s709_s16 = spop %708 }
 0x307   :  { %s711_s17 = spop %710 }
 0x308   :  { %s485_s25 = sadd.f32 %s711_s17, %s709_s16 }
 0x30e   :  { %s713_s18 = spop %712 }
 0x30f   :  { %s497_s29 = sadd.f32 %s713_s18, %s485_s25 }
 0x313   :  { %s715_s19 = spop %714 }
 0x314   :  { %s509_s5 = sadd.f32 %s715_s19, %s497_s29 }
 0x316   :  { %s717_s20 = spop %716 }
 0x317   :  { %s719_s21 = spop %718  ;;  %s521_s11 = sadd.f32 %s717_s20, %s509_s5 }
 0x318   :  { %s721_s22 = spop %720 }
 0x319   :  { %s546_s23 = sadd.f32 %s721_s22, %s719_s21  ;;  %s723_s24 = spop %722 }
 0x31a   :  { %s725_s26 = spop %724  ;;  %s797_s21 = scalar_lea.hbm %s896_s2, 16 }
 0x31b   :  { %s558_s27 = sadd.f32 %s723_s24, %s546_s23  ;;  %s727_s28 = spop %726 }
 0x31c   :  { %s729_s30 = spop %728  ;;  %p798_p2 = scmp.ne.s32.totalorder %s896_s2, %s797_s21 }
 0x31d   :  { %s570_s0 = sadd.f32 %s725_s26, %s558_s27  ;;  %s731_s3 = spop %730 }
 0x31e   :  { %s607_s1 = sadd.f32 %s731_s3, %s729_s30  ;;  %s733_s4 = spop %732 }
 0x31f   :  { %s735_s7 = spop %734  ;;  %s582_s8 = sadd.f32 %s727_s28, %s570_s0 }
 0x320   :  { %s619_s6 = sadd.f32 %s733_s4, %s607_s1  ;;  %s737_s9 = spop %736 }
 0x321   :  { %s644_s13 = sadd.f32 %s582_s8, %s521_s11  ;;  %p801_p3 = scmp.lt.u32.totalorder %s797_s21, %s896_s2 }
 0x322   :  { %s631_s10 = sadd.f32 %s735_s7, %s619_s6 }
 0x323   :  { %p803_p4 = pnand %p801_p3, %p798_p2 }
 0x324   :  { %s643_s12 = sadd.f32 %s737_s9, %s631_s10 }
 0x326   :  { %s645_s14 = smul.f32 2.0, %s643_s12 }
 0x328   :  { %s646_s15 = ssub.f32 %s644_s13, %s645_s14 }
 0x32a   :  { %s647_s16 = smul.f32 0.015625, %s646_s15 }
 0x32c   :  { %649 = sst [smem:[#allocation7]] %s647_s16 }
 0x32d   :  { %806 = shalt.err (!%p803_p4)
}
 0x32e   :  { %s819_s20 = smov [#allocation7]  }
 0x32f   :  { %657 = dma.smem_to_hbm %s819_s20, 16, %s896_s2, [#allocation4]  }
 0x330   :  { %811 = dma.done.wait [#allocation4], 16  }
 0x331   :  { %812 = vsyncadd [#allocation4], 4294967280 }
 0x332   :  { %661 = sfence }
 0x333   :  { %662 = vsyncpa [#allocation3], 1 }
 0x334   :  { %663 = vsyncpa [#allocation6], 1 }
 0x335   :  { %664 = vsyncpa [#allocation4], 1 }

</bundles_post_ra>
